<compile_context>
chip_gen: v7x
topology: tpu7x:2x2x1
jax: 0.10.0
libtpu: 0.0.40
codegen_flags: <defaults>
</compile_context>

<pallas_src>
import jax
import jax.numpy as jnp
import numpy as np
from jax.experimental import pallas as pl
from jax.experimental.pallas import tpu as pltpu


# ----------------------------------------------------------------------------------
# SepConv math (depthwise 3x3, pad=1, bias-free -> pointwise 1x1, bias-free).
# Used (a) to fold each SepConv layer into one matrix at setup time and (b) as the
# pure-jnp reference.  Pointwise is an explicit broadcast-multiply-sum so the reference
# and the fold are independent of XLA matmul-precision defaults.
# ----------------------------------------------------------------------------------
def _sepconv_apply(z, dw, pw):
    """z: (M, Cin, H, W); dw: (3, 3, Cin); pw: (Cin, Cout) -> (M, Cout, H, W)."""
    H, W = z.shape[-2], z.shape[-1]
    zp = jnp.pad(z, ((0, 0), (0, 0), (1, 1), (1, 1)))
    acc = jnp.zeros_like(z)
    for dy in range(3):                                    # depthwise 3x3, zero padding
        for dx in range(3):
            acc = acc + zp[:, :, dy:dy + H, dx:dx + W] * dw[dy, dx][None, :, None, None]
    return jnp.sum(acc[:, :, None] * pw[None, :, :, None, None], axis=1)   # pointwise 1x1


def _sepconv_matrix(dw, pw, C, H, W, dtype):
    """Fold depthwise+pointwise into one (C*H*W, Cout*H*W) matrix: row i = sepconv(e_i)."""
    F_in = C * H * W
    basis = jnp.eye(F_in, dtype=jnp.float32).reshape(F_in, C, H, W)
    m = _sepconv_apply(basis, dw, pw).reshape(F_in, -1)
    return m.astype(dtype)


def prepare_gcn_operands(params, C, H, W, dtype=jnp.bfloat16):
    """One-time weight preprocessing.  Call once and cache alongside the params
    (hoisted out of the jitted forward per the performance review)."""
    C_mid = params["pw1"].shape[1]
    return {
        "M1": _sepconv_matrix(params["dw1"], params["pw1"], C, H, W, dtype),
        "M2": _sepconv_matrix(params["dw2"], params["pw2"], C_mid, H, W, dtype),
    }


# ----------------------------------------------------------------------------------
# Fused kernel: adjacency -> SepConv1 -> adjacency -> SepConv2, all resident in VMEM.
# Four back-to-back MXU matmuls; operands in the compute dtype (bf16 by default),
# accumulation in f32 via preferred_element_type.
# ----------------------------------------------------------------------------------
def _fused_gcn_kernel(a_ref, m1_ref, m2_ref, x_ref, o_ref):
    cdt = m1_ref.dtype
    A = a_ref[...]                                  # (M, M) block-diag kron(I_TB, adj)
    x = x_ref[...].astype(cdt)                      # (M, F_in) lane-dense activation
    # TODO(synk): Dropout2d is the inference-mode identity; training-mode channel dropout
    # and the dynamic=True (similarity-adjacency) branch are not implemented.
    h = jnp.dot(A, x, preferred_element_type=jnp.float32)                          # adj 1
    h = jnp.dot(h.astype(cdt), m1_ref[...], preferred_element_type=jnp.float32)    # SepConv1
    h = jnp.dot(A, h.astype(cdt), preferred_element_type=jnp.float32)              # adj 2
    h = jnp.dot(h.astype(cdt), m2_ref[...], preferred_element_type=jnp.float32)    # SepConv2
    # (Optional further collapse: with no nonlinearity anywhere, this equals
    #  kron(I,A^2) @ x @ (M1 @ M2); kept as 4 matmuls to mirror the module stage-by-stage.)
    o_ref[...] = h.astype(o_ref.dtype)


def _pick_batch_tile(B, N, target_rows=256):
    """Smallest divisor TB of B with TB*N >= min(target_rows, B*N) rows, respecting the
    (8,128) sublane rule (>=256 rows fills the v6e/v7x MXU; chunks shard across TCs)."""
    for tb in range(1, B + 1):
        if B % tb:
            continue
        rows = tb * N
        if rows >= min(target_rows, B * N) and (rows % 8 == 0 or tb == B):
            return tb
    return B


def conv_based_gcn_forward(x, A, M1, M2):
    """
    x : (B, N, C, H, W) float32
    A : (N, N) adjacency, shared over the batch (module's non-dynamic path)
    M1: (C*HW,    Cmid*HW) folded SepConv-1 matrix (from prepare_gcn_operands)
    M2: (Cmid*HW, Cout*HW) folded SepConv-2 matrix
    returns (B, N, Cout, H, W)
    """
    B, N, C, H, W = x.shape
    HW = H * W
    F_in = C * HW
    F_mid, F_out = M1.shape[1], M2.shape[1]
    assert M1.shape[0] == F_in and M2.shape[0] == F_mid
    Cout = F_out // HW

    cdt = M1.dtype
    TB = _pick_batch_tile(B, N)
    n_chunks = B // TB
    M_rows = TB * N

    # Batch folded into the matmul M axis: block-diagonal adjacency for one batch chunk.
    # Tiny ((TB*N)^2 elements); built per call since A is a runtime argument.
    A_blk = jnp.kron(jnp.eye(TB, dtype=cdt), A.astype(cdt))          # (M_rows, M_rows)

    # Free reshape: merges contiguous (N, C, H, W) dims; no transpose, no extra HBM pass.
    x_flat = x.reshape(B * N, F_in)

    itemsize = lambda dt: jnp.dtype(dt).itemsize
    w_bytes = (M_rows * M_rows + F_in * F_mid + F_mid * F_out) * itemsize(cdt)
    act_bytes = M_rows * (F_in + F_out) * itemsize(x.dtype)
    tmp_bytes = 6 * M_rows * max(F_in, F_mid, F_out) * 4              # f32 in-kernel temps
    vmem_limit = int(min(96 << 20,
                         max(32 << 20, 2 * (w_bytes + act_bytes) + tmp_bytes + (8 << 20))))
    # TODO(synk): for H=W>=16 on v7x (64 MiB VMEM) additionally single-buffer the
    # grid-invariant weight specs (pipeline_mode=pl.Buffered(1)) and/or add a second
    # "parallel" grid axis tiling the F_out columns of M2.

    inv = lambda i: (0, 0)                     # grid-invariant blocks stay resident in VMEM
    out = pl.pallas_call(
        _fused_gcn_kernel,
        out_shape=jax.ShapeDtypeStruct((B * N, F_out), x.dtype),
        grid=(n_chunks,),
        in_specs=[
            pl.BlockSpec((M_rows, M_rows), inv),             # block-diag adjacency
            pl.BlockSpec((F_in, F_mid), inv),                # folded SepConv-1 matrix
            pl.BlockSpec((F_mid, F_out), inv),               # folded SepConv-2 matrix
            pl.BlockSpec((M_rows, F_in), lambda i: (i, 0)),  # activation chunk (lane-dense)
        ],
        out_specs=pl.BlockSpec((M_rows, F_out), lambda i: (i, 0)),
        compiler_params=pltpu.CompilerParams(
            dimension_semantics=("parallel",),               # batch chunks shard over TCs
            vmem_limit_bytes=vmem_limit),
    )(A_blk, M1, M2, x_flat)

    return out.reshape(B, N, Cout, H, W)


# ----------------------------------------------------------------------------------
# Parameters (shapes follow the PyTorch module: bias-free SepConv layers).
# PyTorch depthwise (C,1,3,3) -> stored (3,3,C); pointwise (Cout,Cin,1,1) -> stored (Cin,Cout).
# ----------------------------------------------------------------------------------
def init_params(key, in_ch, out_ch):
    mid = in_ch // 2
    k1, k2, k3, k4 = jax.random.split(key, 4)
    return {
        "dw1": 0.1 * jax.random.normal(k1, (3, 3, in_ch), jnp.float32),
        "pw1": 0.1 * jax.random.normal(k2, (in_ch, mid), jnp.float32),
        "dw2": 0.1 * jax.random.normal(k3, (3, 3, mid), jnp.float32),
        "pw2": 0.1 * jax.random.normal(k4, (mid, out_ch), jnp.float32),
    }


# ----------------------------------------------------------------------------------
# Pure-jnp reference (exact f32 elementwise math, mirrors the PyTorch forward).
# ----------------------------------------------------------------------------------
def _reference_forward(x, A, params):
    B, N, C, H, W = x.shape

    def adj(z):  # einsum('b m n, b n c h w -> b m c h w') with A shared over the batch
        return jnp.sum(A[None, :, :, None, None, None] * z[:, None], axis=2)

    h = adj(x).reshape(B * N, C, H, W)
    h = _sepconv_apply(h, params["dw1"], params["pw1"])
    h = adj(h.reshape(B, N, -1, H, W)).reshape(B * N, -1, H, W)
    h = _sepconv_apply(h, params["dw2"], params["pw2"])
    return h.reshape(B, N, -1, H, W)


if __name__ == "__main__":
    B, N, C, H, W = 2, 4, 8, 8, 8          # in_ch = 8 -> mid = 4 -> out_ch = 8
    out_ch = 8

    key = jax.random.PRNGKey(0)
    kx, ka, kp = jax.random.split(key, 3)
    x = jax.random.normal(kx, (B, N, C, H, W), jnp.float32)
    # row-stochastic adjacency (NxN), as typically fed to the module
    A = jax.nn.softmax(jax.random.normal(ka, (N, N), jnp.float32), axis=-1)
    params = init_params(kp, C, out_ch)

    ref = jax.block_until_ready(_reference_forward(x, A, params))
    fwd = jax.jit(conv_based_gcn_forward)

    # f32 MXU operands: tight correctness check of the folded / fused kernel.
    ops32 = prepare_gcn_operands(params, C, H, W, dtype=jnp.float32)
    out32 = jax.block_until_ready(fwd(x, A, ops32["M1"], ops32["M2"]))
    assert out32.shape == (B, N, out_ch, H, W)
    np.testing.assert_allclose(np.asarray(out32), np.asarray(ref), rtol=1e-4, atol=1e-5)

    # bf16 MXU operands (default fast path, f32 accumulation): looser tolerance.
    ops16 = prepare_gcn_operands(params, C, H, W, dtype=jnp.bfloat16)
    out16 = jax.block_until_ready(fwd(x, A, ops16["M1"], ops16["M2"]))
    assert out16.shape == (B, N, out_ch, H, W)
    np.testing.assert_allclose(np.asarray(out16), np.asarray(ref), rtol=3e-2, atol=3e-3)

    print("KERNEL_OK")
</pallas_src>

<mosaic_0001>
module attributes {stable_mosaic.version = 11 : i64} {
  func.func @_fused_gcn_kernel(%arg0: i32, %arg1: memref<8x8xf32, #tpu.memory_space<vmem>>, %arg2: memref<512x256xf32, #tpu.memory_space<vmem>>, %arg3: memref<256x512xf32, #tpu.memory_space<vmem>>, %arg4: memref<8x512xf32, #tpu.memory_space<vmem>>, %arg5: memref<8x512xf32, #tpu.memory_space<vmem>>) attributes {dimension_semantics = [#tpu.dimension_semantics<parallel>], iteration_bounds = array<i64: 1>, scalar_prefetch = 0 : i64, scratch_operands = 0 : i64, tpu.core_type = #tpu.core_type<tc>, window_params = [{pipeline_mode = #tpu.pipeline_mode<synchronous>, transform_indices = @transform_0, window_bounds = array<i64: 8, 8>}, {pipeline_mode = #tpu.pipeline_mode<synchronous>, transform_indices = @transform_1, window_bounds = array<i64: 512, 256>}, {pipeline_mode = #tpu.pipeline_mode<synchronous>, transform_indices = @transform_2, window_bounds = array<i64: 256, 512>}, {transform_indices = @transform_3, window_bounds = array<i64: 8, 512>}, {transform_indices = @transform_4, window_bounds = array<i64: 8, 512>}]} {
    %c0 = arith.constant 0 : index
    %c0_0 = arith.constant 0 : index
    %0 = vector.load %arg1[%c0, %c0_0] : memref<8x8xf32, #tpu.memory_space<vmem>>, vector<8x8xf32>
    %c0_1 = arith.constant 0 : index
    %c0_2 = arith.constant 0 : index
    %1 = vector.load %arg4[%c0_1, %c0_2] : memref<8x512xf32, #tpu.memory_space<vmem>>, vector<8x512xf32>
    %cst = arith.constant dense<0.000000e+00> : vector<8x512xf32>
    %2 = tpu.matmul %0, %1, %cst {dimension_numbers = #tpu.dot_dimension_numbers<[1], [0], [0], [1], [0, 0, 1, 1], [], []>} : vector<8x8xf32>, vector<8x512xf32>, vector<8x512xf32> -> vector<8x512xf32>
    %c0_3 = arith.constant 0 : index
    %c0_4 = arith.constant 0 : index
    %3 = vector.load %arg2[%c0_3, %c0_4] : memref<512x256xf32, #tpu.memory_space<vmem>>, vector<512x256xf32>
    %cst_5 = arith.constant dense<0.000000e+00> : vector<8x256xf32>
    %4 = tpu.matmul %2, %3, %cst_5 {dimension_numbers = #tpu.dot_dimension_numbers<[1], [0], [0], [1], [0, 0, 1, 1], [], []>} : vector<8x512xf32>, vector<512x256xf32>, vector<8x256xf32> -> vector<8x256xf32>
    %cst_6 = arith.constant dense<0.000000e+00> : vector<8x256xf32>
    %5 = tpu.matmul %0, %4, %cst_6 {dimension_numbers = #tpu.dot_dimension_numbers<[1], [0], [0], [1], [0, 0, 1, 1], [], []>} : vector<8x8xf32>, vector<8x256xf32>, vector<8x256xf32> -> vector<8x256xf32>
    %c0_7 = arith.constant 0 : index
    %c0_8 = arith.constant 0 : index
    %6 = vector.load %arg3[%c0_7, %c0_8] : memref<256x512xf32, #tpu.memory_space<vmem>>, vector<256x512xf32>
    %cst_9 = arith.constant dense<0.000000e+00> : vector<8x512xf32>
    %7 = tpu.matmul %5, %6, %cst_9 {dimension_numbers = #tpu.dot_dimension_numbers<[1], [0], [0], [1], [0, 0, 1, 1], [], []>} : vector<8x256xf32>, vector<256x512xf32>, vector<8x512xf32> -> vector<8x512xf32>
    %c0_10 = arith.constant 0 : index
    %c0_11 = arith.constant 0 : index
    %8 = vector.load %arg5[%c0_10, %c0_11] : memref<8x512xf32, #tpu.memory_space<vmem>>, vector<8x512xf32>
    tpu.vector_store %arg5[%c0_10, %c0_11], %7 {strides = array<i32>} : memref<8x512xf32, #tpu.memory_space<vmem>>, vector<8x512xf32>,
    return
  }
  func.func @transform_0(%arg0: i32) -> (i32, i32) {
    %c0_i32 = arith.constant 0 : i32
    %c0_i32_0 = arith.constant 0 : i32
    %c0_i32_1 = arith.constant 0 : i32
    return %c0_i32, %c0_i32_0 : i32, i32
  }
  func.func @transform_1(%arg0: i32) -> (i32, i32) {
    %c0_i32 = arith.constant 0 : i32
    %c0_i32_0 = arith.constant 0 : i32
    %c0_i32_1 = arith.constant 0 : i32
    return %c0_i32, %c0_i32_0 : i32, i32
  }
  func.func @transform_2(%arg0: i32) -> (i32, i32) {
    %c0_i32 = arith.constant 0 : i32
    %c0_i32_0 = arith.constant 0 : i32
    %c0_i32_1 = arith.constant 0 : i32
    return %c0_i32, %c0_i32_0 : i32, i32
  }
  func.func @transform_3(%arg0: i32) -> (i32, i32) {
    %c0_i32 = arith.constant 0 : i32
    %c0_i32_0 = arith.constant 0 : i32
    return %arg0, %c0_i32 : i32, i32
  }
  func.func @transform_4(%arg0: i32) -> (i32, i32) {
    %c0_i32 = arith.constant 0 : i32
    %c0_i32_0 = arith.constant 0 : i32
    return %arg0, %c0_i32 : i32, i32
  }
}

</mosaic_0001>

<bundles_post_ra>
// kernel: conv_based_gcn_forward.1
= control target key start
LH: loop header
LB: loop body
LE: loop exit
PB: predicated region body
PF: predicated region fallthrough
CT: control target
= control target key end

     0   :  { %9 = vsyncpa [#allocation3], 0  ;;  %s1231_s0 = inlined_call_operand.vmem [shape: f32[8,8], index: 0, kind: input, shape index: {}]   ;;  %s1232_s1 = inlined_call_operand.hbm [shape: f32[512,256], index: 1, kind: input, shape index: {}]   ;;  %s1233_s2 = inlined_call_operand.hbm [shape: f32[256,512], index: 2, kind: input, shape index: {}]   ;;  %s1234_s3 = inlined_call_operand.vmem [shape: f32[8,512], index: 3, kind: input, shape index: {}]   ;;  %s1235_s4 = inlined_call_operand.vmem [shape: f32[8,512], index: 4, kind: output, shape index: {}]  }
   0x1   :  { %10 = vsyncpa [#allocation5], 0  ;;  %s1133_s15 = smov [#allocation2]   ;;  %s1085_s19 = scalar_lea.hbm %s1232_s1, 16384 }
   0x2   :  { %s18_s16 = sshll.u32 %s1133_s15, 4  ;;  %p1086_p0 = scmp.ne.s32.totalorder %s1232_s1, %s1085_s19  ;;  %s19_s16 = int_to_ptr.vmem [resolvable:$true] %s18_s16 }
   0x3   :  { %p1089_p1 = scmp.lt.u32.totalorder %s1085_s19, %s1232_s1 }
   0x5   :  { %p1091_p2 = pnand %p1089_p1, %p1086_p0 }
   0x7   :  { %1094 = shalt.err (!%p1091_p2)
}
   0x8   :  { %s1095_s24 = scalar_lea.vmem %s19_s16, 16384  ;;  %p1100_p4 = scmp.lt.s32.totalorder %s19_s16, %s19_s16 }
   0x9   :  { %p1096_p3 = scmp.ne.s32.totalorder %s19_s16, %s1095_s24  ;;  %p1101_p5 = scmp.lt.s32.totalorder %s1095_s24, %s1095_s24 }
   0xb   :  { %p1102_p6 = por %p1101_p5, %p1100_p4 }
   0xd   :  { %p1103_p7 = pnand %p1102_p6, %p1096_p3 }
   0xf   :  { %1106 = shalt.err (!%p1103_p7)
}
  0x10   :  { %s1134_s25 = smov 256   ;;  %s1135_s26 = smov 16  }
  0x11   :  { %24 = dma.hbm_to_vmem [thread:$0]  %s1232_s1, 16384, %s19_s16, [#allocation3], %s1134_s25, %s1134_s25, %s1135_s26  }
  0x12   :  { %s1136_s29 = smov [#allocation4]   ;;  %s1107_s7 = scalar_lea.hbm %s1233_s2, 16384 }
  0x13   :  { %s30_s30 = sshll.u32 %s1136_s29, 4  ;;  %p1108_p8 = scmp.ne.s32.totalorder %s1233_s2, %s1107_s7  ;;  %s31_s30 = int_to_ptr.vmem [resolvable:$true] %s30_s30 }
  0x14   :  { %p1111_p9 = scmp.lt.u32.totalorder %s1107_s7, %s1233_s2 }
  0x16   :  { %p1113_p10 = pnand %p1111_p9, %p1108_p8 }
  0x18   :  { %1116 = shalt.err (!%p1113_p10)
}
  0x19   :  { %s1117_s12 = scalar_lea.vmem %s31_s30, 16384  ;;  %p1122_p12 = scmp.lt.s32.totalorder %s31_s30, %s31_s30 }
  0x1a   :  { %p1118_p11 = scmp.ne.s32.totalorder %s31_s30, %s1117_s12  ;;  %p1123_p13 = scmp.lt.s32.totalorder %s1117_s12, %s1117_s12 }
  0x1c   :  { %p1124_p0 = por %p1123_p13, %p1122_p12 }
  0x1e   :  { %p1125_p1 = pnand %p1124_p0, %p1118_p11 }
  0x20   :  { %1128 = shalt.err (!%p1125_p1)
}
  0x21   :  { %s1137_s1 = smov 512   ;;  %s1138_s13 = smov 32  }
  0x22   :  { %36 = dma.hbm_to_vmem [thread:$0]  %s1233_s2, 16384, %s31_s30, [#allocation5], %s1137_s1, %s1137_s1, %s1138_s13  }
  0x23   :  { %1129 = dma.done.wait [#allocation3], 16384  }
  0x24   :  { %1130 = vsyncadd [#allocation3], 4294950912 }
  0x25   :  { %1131 = dma.done.wait [#allocation5], 16384  }
  0x26   :  { %1132 = vsyncadd [#allocation5], 4294950912  ;;  %v1139_v0 = vmov 0.0   ;;  %v47_v1 = vld [vmem:[%s1234_s3 + $0x8] sm:$0xff]  ;;  %v46_v2 = vld [vmem:[%s1234_s3] sm:$0xff]  ;;  %vm50_vm0 = vcmask 64512  }
  0x27   :  { %118 = vmatprep.mubr.f32.mxu0 %v1139_v0  ;;  %189 = vmatprep.mubr.f32.mxu1 %v1139_v0  ;;  %v1198_v3 = vld [vmem:[%s1231_s0] sm:$0xff]  ;;  %v49_v4 = vld [vmem:[%s1234_s3 + $0x18] sm:$0xff]  ;;  %v48_v5 = vld [vmem:[%s1234_s3 + $0x10] sm:$0xff] }
  0x28   :  { %54 = vmatprep.subr.mxu0 %v47_v1  ;;  %v197_v6 = vld [vmem:[#allocation2 + $0x8] sm:$0xff]  ;;  %125 = vmatprep.subr.mxu1 %v49_v4  ;;  %v199_v7 = vld [vmem:[#allocation2 + $0x18] sm:$0xff]  ;;  %v196_v8 = vld [vmem:[#allocation2] sm:$0xff] }
  0x29   :  { %55 = vmatpush1.msra.mxu0 %v46_v2  ;;  %v198_v9 = vld [vmem:[#allocation2 + $0x10] sm:$0xff]  ;;  %126 = vmatpush1.msra.mxu1 %v48_v5  ;;  %v820_v10 = vpack.c.bf16 %v199_v7, %v197_v6  ;;  %v201_v12 = vld [vmem:[#allocation2 + $0x28] sm:$0xff]  ;;  %v203_v13 = vld [vmem:[#allocation2 + $0x38] sm:$0xff] }
  0x2a   :  { %817 = vmatmul.mubr.msk.f32.vlgmr.msra.gmra.mrb[0].mxu0 %vm50_vm0, %v1198_v3  ;;  %v822_v11 = vpack.c.bf16 %v198_v9, %v196_v8  ;;  %v200_v14 = vld [vmem:[#allocation2 + $0x20] sm:$0xff]  ;;  %818 = vmatmul.mubr.msk.f32.vlgmr.msra.gmra.mrb[0].mxu1 %vm50_vm0, %v1198_v3  ;;  %v824_v15 = vpack.c.bf16 %v203_v13, %v201_v12  ;;  %v202_v16 = vld [vmem:[#allocation2 + $0x30] sm:$0xff]  ;;  %v205_v17 = vld [vmem:[#allocation2 + $0x48] sm:$0xff] }
  0x2b   :  { %v207_v18 = vld [vmem:[#allocation2 + $0x58] sm:$0xff]  ;;  %821 = vmatprep.subr.bf16.mxu0 %v820_v10  ;;  %530 = vmatprep.mubr.f32.mxu1 %v1139_v0  ;;  %v826_v19 = vpack.c.bf16 %v202_v16, %v200_v14  ;;  %v204_v21 = vld [vmem:[#allocation2 + $0x40] sm:$0xff]  ;;  %v206_v22 = vld [vmem:[#allocation2 + $0x50] sm:$0xff] }
  0x2c   :  { %823 = vmatpush1.bf16.msra.mxu0 %v822_v11  ;;  %v828_v20 = vpack.c.bf16 %v207_v18, %v205_v17  ;;  %v209_v23 = vld [vmem:[#allocation2 + $0x68] sm:$0xff]  ;;  %v211_v24 = vld [vmem:[#allocation2 + $0x78] sm:$0xff]  ;;  %v830_v25 = vpack.c.bf16 %v206_v22, %v204_v21  ;;  %v208_v27 = vld [vmem:[#allocation2 + $0x60] sm:$0xff] }
  0x2d   :  { %825 = vmatprep.subr.bf16.mxu0 %v824_v15  ;;  %v832_v26 = vpack.c.bf16 %v211_v24, %v209_v23  ;;  %v210_v28 = vld [vmem:[#allocation2 + $0x70] sm:$0xff]  ;;  %v213_v29 = vld [vmem:[#allocation2 + $0x88] sm:$0xff]  ;;  %v215_v30 = vld [vmem:[#allocation2 + $0x98] sm:$0xff] }
  0x2e   :  { %v834_v31 = vpack.c.bf16 %v210_v28, %v208_v27  ;;  %v836_v32 = vpack.c.bf16 %v215_v30, %v213_v29  ;;  %v212_v33 = vld [vmem:[#allocation2 + $0x80] sm:$0xff]  ;;  %v214_v34 = vld [vmem:[#allocation2 + $0x90] sm:$0xff]  ;;  %v217_v35 = vld [vmem:[#allocation2 + $0xa8] sm:$0xff] }
  0x2f   :  { %v219_v36 = vld [vmem:[#allocation2 + $0xb8] sm:$0xff]  ;;  %v838_v37 = vpack.c.bf16 %v214_v34, %v212_v33  ;;  %v216_v39 = vld [vmem:[#allocation2 + $0xa0] sm:$0xff]  ;;  %v218_v40 = vld [vmem:[#allocation2 + $0xb0] sm:$0xff] }
  0x30   :  { %827 = vmatpush1.bf16.msra.mxu0 %v826_v19  ;;  %v840_v38 = vpack.c.bf16 %v219_v36, %v217_v35  ;;  %v221_v41 = vld [vmem:[#allocation2 + $0xc8] sm:$0xff]  ;;  %v223_v42 = vld [vmem:[#allocation2 + $0xd8] sm:$0xff]  ;;  %v842_v43 = vpack.c.bf16 %v218_v40, %v216_v39  ;;  %v220_v45 = vld [vmem:[#allocation2 + $0xc0] sm:$0xff] }
  0x31   :  { %829 = vmatprep.subr.bf16.mxu0 %v828_v20  ;;  %v844_v44 = vpack.c.bf16 %v223_v42, %v221_v41  ;;  %v222_v46 = vld [vmem:[#allocation2 + $0xd0] sm:$0xff]  ;;  %v225_v47 = vld [vmem:[#allocation2 + $0xe8] sm:$0xff]  ;;  %v227_v48 = vld [vmem:[#allocation2 + $0xf8] sm:$0xff] }
  0x32   :  { %v846_v49 = vpack.c.bf16 %v222_v46, %v220_v45  ;;  %v848_v50 = vpack.c.bf16 %v227_v48, %v225_v47  ;;  %v224_v51 = vld [vmem:[#allocation2 + $0xe0] sm:$0xff]  ;;  %v226_v52 = vld [vmem:[#allocation2 + $0xf0] sm:$0xff]  ;;  %v229_v53 = vld [vmem:[#allocation2 + $0x108] sm:$0xff] }
  0x33   :  { %v231_v54 = vld [vmem:[#allocation2 + $0x118] sm:$0xff]  ;;  %v850_v55 = vpack.c.bf16 %v226_v52, %v224_v51  ;;  %v228_v57 = vld [vmem:[#allocation2 + $0x100] sm:$0xff]  ;;  %v230_v58 = vld [vmem:[#allocation2 + $0x110] sm:$0xff] }
  0x34   :  { %831 = vmatpush1.bf16.msra.mxu0 %v830_v25  ;;  %v852_v56 = vpack.c.bf16 %v231_v54, %v229_v53  ;;  %v233_v59 = vld [vmem:[#allocation2 + $0x128] sm:$0xff]  ;;  %v235_v60 = vld [vmem:[#allocation2 + $0x138] sm:$0xff]  ;;  %v854_v61 = vpack.c.bf16 %v230_v58, %v228_v57  ;;  %v232_v63 = vld [vmem:[#allocation2 + $0x120] sm:$0xff] }
  0x35   :  { %833 = vmatprep.subr.bf16.mxu0 %v832_v26  ;;  %v856_v62 = vpack.c.bf16 %v235_v60, %v233_v59  ;;  %v234_v0 = vld [vmem:[#allocation2 + $0x130] sm:$0xff]  ;;  %v237_v1 = vld [vmem:[#allocation2 + $0x148] sm:$0xff]  ;;  %v239_v2 = vld [vmem:[#allocation2 + $0x158] sm:$0xff] }
  0x36   :  { %v858_v4 = vpack.c.bf16 %v234_v0, %v232_v63  ;;  %v860_v5 = vpack.c.bf16 %v239_v2, %v237_v1  ;;  %v236_v6 = vld [vmem:[#allocation2 + $0x140] sm:$0xff]  ;;  %v238_v7 = vld [vmem:[#allocation2 + $0x150] sm:$0xff]  ;;  %v241_v8 = vld [vmem:[#allocation2 + $0x168] sm:$0xff] }
  0x37   :  { %v243_v9 = vld [vmem:[#allocation2 + $0x178] sm:$0xff]  ;;  %v862_v10 = vpack.c.bf16 %v238_v7, %v236_v6  ;;  %v240_v12 = vld [vmem:[#allocation2 + $0x160] sm:$0xff]  ;;  %v242_v13 = vld [vmem:[#allocation2 + $0x170] sm:$0xff] }
  0x38   :  { %835 = vmatpush1.bf16.msra.mxu0 %v834_v31  ;;  %v864_v11 = vpack.c.bf16 %v243_v9, %v241_v8  ;;  %v245_v14 = vld [vmem:[#allocation2 + $0x188] sm:$0xff]  ;;  %v247_v15 = vld [vmem:[#allocation2 + $0x198] sm:$0xff]  ;;  %v866_v16 = vpack.c.bf16 %v242_v13, %v240_v12  ;;  %v244_v18 = vld [vmem:[#allocation2 + $0x180] sm:$0xff] }
  0x39   :  { %837 = vmatprep.subr.bf16.mxu0 %v836_v32  ;;  %v868_v17 = vpack.c.bf16 %v247_v15, %v245_v14  ;;  %v246_v19 = vld [vmem:[#allocation2 + $0x190] sm:$0xff]  ;;  %v249_v20 = vld [vmem:[#allocation2 + $0x1a8] sm:$0xff]  ;;  %v251_v21 = vld [vmem:[#allocation2 + $0x1b8] sm:$0xff] }
  0x3a   :  { %v870_v22 = vpack.c.bf16 %v246_v19, %v244_v18  ;;  %v872_v23 = vpack.c.bf16 %v251_v21, %v249_v20  ;;  %v248_v24 = vld [vmem:[#allocation2 + $0x1a0] sm:$0xff]  ;;  %v250_v25 = vld [vmem:[#allocation2 + $0x1b0] sm:$0xff]  ;;  %v253_v26 = vld [vmem:[#allocation2 + $0x1c8] sm:$0xff] }
  0x3b   :  { %v255_v27 = vld [vmem:[#allocation2 + $0x1d8] sm:$0xff]  ;;  %v874_v28 = vpack.c.bf16 %v250_v25, %v248_v24  ;;  %v252_v30 = vld [vmem:[#allocation2 + $0x1c0] sm:$0xff]  ;;  %v254_v31 = vld [vmem:[#allocation2 + $0x1d0] sm:$0xff] }
  0x3c   :  { %839 = vmatpush1.bf16.msra.mxu0 %v838_v37  ;;  %v876_v29 = vpack.c.bf16 %v255_v27, %v253_v26  ;;  %v257_v32 = vld [vmem:[#allocation2 + $0x1e8] sm:$0xff]  ;;  %v259_v33 = vld [vmem:[#allocation2 + $0x1f8] sm:$0xff]  ;;  %v878_v34 = vpack.c.bf16 %v254_v31, %v252_v30  ;;  %v256_v36 = vld [vmem:[#allocation2 + $0x1e0] sm:$0xff] }
  0x3d   :  { %841 = vmatprep.subr.bf16.mxu0 %v840_v38  ;;  %v880_v35 = vpack.c.bf16 %v259_v33, %v257_v32  ;;  %v258_v37 = vld [vmem:[#allocation2 + $0x1f0] sm:$0xff]  ;;  %v261_v39 = vld [vmem:[#allocation2 + $0x208] sm:$0xff]  ;;  %v263_v40 = vld [vmem:[#allocation2 + $0x218] sm:$0xff] }
  0x3e   :  { %v882_v38 = vpack.c.bf16 %v258_v37, %v256_v36  ;;  %v884_v41 = vpack.c.bf16 %v263_v40, %v261_v39  ;;  %v260_v42 = vld [vmem:[#allocation2 + $0x200] sm:$0xff]  ;;  %v267_v45 = vld [vmem:[#allocation2 + $0x238] sm:$0xff]  ;;  %v266_v51 = vld [vmem:[#allocation2 + $0x230] sm:$0xff] }
  0x3f   :  { %v269_v53 = vld [vmem:[#allocation2 + $0x248] sm:$0xff]  ;;  %v271_v54 = vld [vmem:[#allocation2 + $0x258] sm:$0xff]  ;;  %v268_v58 = vld [vmem:[#allocation2 + $0x240] sm:$0xff] }
  0x40   :  { %843 = vmatpush1.bf16.msra.mxu0 %v842_v43  ;;  %v262_v43 = vld [vmem:[#allocation2 + $0x210] sm:$0xff]  ;;  %v892_v57 = vpack.c.bf16 %v271_v54, %v269_v53  ;;  %v273_v60 = vld [vmem:[#allocation2 + $0x268] sm:$0xff]  ;;  %v272_v0 = vld [vmem:[#allocation2 + $0x260] sm:$0xff] }
  0x41   :  { %845 = vmatprep.subr.bf16.mxu0 %v844_v44  ;;  %v265_v44 = vld [vmem:[#allocation2 + $0x228] sm:$0xff]  ;;  %v886_v47 = vpack.c.bf16 %v262_v43, %v260_v42  ;;  %v270_v59 = vld [vmem:[#allocation2 + $0x250] sm:$0xff]  ;;  %v276_v7 = vld [vmem:[#allocation2 + $0x280] sm:$0xff] }
  0x42   :  { %v274_v1 = vld [vmem:[#allocation2 + $0x270] sm:$0xff]  ;;  %v277_v2 = vld [vmem:[#allocation2 + $0x288] sm:$0xff]  ;;  %v280_v13 = vld [vmem:[#allocation2 + $0x2a0] sm:$0xff] }
  0x43   :  { %v278_v8 = vld [vmem:[#allocation2 + $0x290] sm:$0xff]  ;;  %v281_v9 = vld [vmem:[#allocation2 + $0x2a8] sm:$0xff]  ;;  %v284_v19 = vld [vmem:[#allocation2 + $0x2c0] sm:$0xff] }
  0x44   :  { %847 = vmatpush1.bf16.msra.mxu0 %v846_v49  ;;  %v888_v49 = vpack.c.bf16 %v267_v45, %v265_v44  ;;  %v282_v14 = vld [vmem:[#allocation2 + $0x2b0] sm:$0xff]  ;;  %v285_v15 = vld [vmem:[#allocation2 + $0x2c8] sm:$0xff]  ;;  %v288_v25 = vld [vmem:[#allocation2 + $0x2e0] sm:$0xff] }
  0x45   :  { %849 = vmatprep.subr.bf16.mxu0 %v848_v50  ;;  %v264_v50 = vld [vmem:[#allocation2 + $0x220] sm:$0xff]  ;;  %v286_v20 = vld [vmem:[#allocation2 + $0x2d0] sm:$0xff]  ;;  %v289_v21 = vld [vmem:[#allocation2 + $0x2e8] sm:$0xff] }
  0x46   :  { %v290_v26 = vld [vmem:[#allocation2 + $0x2f0] sm:$0xff]  ;;  %v293_v27 = vld [vmem:[#allocation2 + $0x308] sm:$0xff]  ;;  %v292_v31 = vld [vmem:[#allocation2 + $0x300] sm:$0xff] }
  0x47   :  { %v294_v32 = vld [vmem:[#allocation2 + $0x310] sm:$0xff]  ;;  %v297_v33 = vld [vmem:[#allocation2 + $0x328] sm:$0xff]  ;;  %v296_v37 = vld [vmem:[#allocation2 + $0x320] sm:$0xff] }
  0x48   :  { %851 = vmatpush1.bf16.msra.mxu0 %v850_v55  ;;  %v301_v39 = vld [vmem:[#allocation2 + $0x348] sm:$0xff]  ;;  %v303_v40 = vld [vmem:[#allocation2 + $0x358] sm:$0xff]  ;;  %v300_v43 = vld [vmem:[#allocation2 + $0x340] sm:$0xff] }
  0x49   :  { %853 = vmatprep.subr.bf16.mxu0 %v852_v56  ;;  %v890_v56 = vpack.c.bf16 %v266_v51, %v264_v50  ;;  %v924_v42 = vpack.c.bf16 %v303_v40, %v301_v39  ;;  %v302_v44 = vld [vmem:[#allocation2 + $0x350] sm:$0xff]  ;;  %v305_v45 = vld [vmem:[#allocation2 + $0x368] sm:$0xff]  ;;  %v311_v53 = vld [vmem:[#allocation2 + $0x398] sm:$0xff] }
  0x4a   :  { %v306_v50 = vld [vmem:[#allocation2 + $0x370] sm:$0xff]  ;;  %v309_v51 = vld [vmem:[#allocation2 + $0x388] sm:$0xff] }
  0x4b   :  { %v574_v39 = vld [vmem:[#allocation4 + $0x128] sm:$0xff] }
  0x4c   :  { %855 = vmatpush1.bf16.msra.mxu0 %v854_v61  ;;  %v275_v61 = vld [vmem:[#allocation2 + $0x278] sm:$0xff] }
  0x4d   :  { %857 = vmatprep.subr.bf16.mxu0 %v856_v62  ;;  %v894_v62 = vpack.c.bf16 %v270_v59, %v268_v58  ;;  %v896_v63 = vpack.c.bf16 %v275_v61, %v273_v60  ;;  %v313_v58 = vld [vmem:[#allocation2 + $0x3a8] sm:$0xff]  ;;  %v315_v59 = vld [vmem:[#allocation2 + $0x3b8] sm:$0xff] }
  0x4e   :  { %v936_v61 = vpack.c.bf16 %v315_v59, %v313_v58 }
  0x50   :  { %859 = vmatpush1.bf16.msra.mxu0 %v858_v4  ;;  %v279_v4 = vld [vmem:[#allocation2 + $0x298] sm:$0xff] }
  0x51   :  { %861 = vmatprep.subr.bf16.mxu0 %v860_v5  ;;  %v898_v5 = vpack.c.bf16 %v274_v1, %v272_v0  ;;  %v900_v6 = vpack.c.bf16 %v279_v4, %v277_v2  ;;  %v317_v0 = vld [vmem:[#allocation2 + $0x3c8] sm:$0xff]  ;;  %v319_v1 = vld [vmem:[#allocation2 + $0x3d8] sm:$0xff] }
  0x52   :  { %v940_v4 = vpack.c.bf16 %v319_v1, %v317_v0 }
  0x54   :  { %863 = vmatpush1.bf16.msra.mxu0 %v862_v10  ;;  %v283_v10 = vld [vmem:[#allocation2 + $0x2b8] sm:$0xff] }
  0x55   :  { %865 = vmatprep.subr.bf16.mxu0 %v864_v11  ;;  %v902_v11 = vpack.c.bf16 %v278_v8, %v276_v7  ;;  %v904_v12 = vpack.c.bf16 %v283_v10, %v281_v9  ;;  %v321_v7 = vld [vmem:[#allocation2 + $0x3e8] sm:$0xff]  ;;  %v323_v8 = vld [vmem:[#allocation2 + $0x3f8] sm:$0xff] }
  0x56   :  { %v944_v10 = vpack.c.bf16 %v323_v8, %v321_v7 }
  0x58   :  { %867 = vmatpush1.bf16.msra.mxu0 %v866_v16  ;;  %v287_v16 = vld [vmem:[#allocation2 + $0x2d8] sm:$0xff] }
  0x59   :  { %869 = vmatprep.subr.bf16.mxu0 %v868_v17  ;;  %v906_v17 = vpack.c.bf16 %v282_v14, %v280_v13  ;;  %v908_v18 = vpack.c.bf16 %v287_v16, %v285_v15  ;;  %v538_v14 = vld [vmem:[#allocation4 + $0x8] sm:$0xff]  ;;  %v537_v16 = vld [vmem:[#allocation4] sm:$0xff] }
  0x5a   :  { %v542_v15 = vld [vmem:[#allocation4 + $0x28] sm:$0xff] }
  0x5c   :  { %871 = vmatpush1.bf16.msra.mxu0 %v870_v22  ;;  %v291_v22 = vld [vmem:[#allocation2 + $0x2f8] sm:$0xff] }
  0x5d   :  { %873 = vmatprep.subr.bf16.mxu0 %v872_v23  ;;  %v910_v23 = vpack.c.bf16 %v286_v20, %v284_v19  ;;  %v912_v24 = vpack.c.bf16 %v291_v22, %v289_v21  ;;  %v550_v19 = vld [vmem:[#allocation4 + $0x68] sm:$0xff]  ;;  %v948_v21 = vpack.c.bf16 %v542_v15, %v538_v14  ;;  %v617_v15 = vld [vmem:[#allocation4 + $0x280] sm:$0xff] }
  0x60   :  { %875 = vmatpush1.bf16.msra.mxu0 %v874_v28  ;;  %v295_v28 = vld [vmem:[#allocation2 + $0x318] sm:$0xff] }
  0x61   :  { %877 = vmatprep.subr.bf16.mxu0 %v876_v29  ;;  %v914_v29 = vpack.c.bf16 %v290_v26, %v288_v25  ;;  %v916_v30 = vpack.c.bf16 %v295_v28, %v293_v27  ;;  %v545_v25 = vld [vmem:[#allocation4 + $0x40] sm:$0xff]  ;;  %v554_v27 = vld [vmem:[#allocation4 + $0x88] sm:$0xff] }
  0x62   :  { %v549_v26 = vld [vmem:[#allocation4 + $0x60] sm:$0xff]  ;;  %v558_v28 = vld [vmem:[#allocation4 + $0xa8] sm:$0xff] }
  0x64   :  { %879 = vmatpush1.bf16.msra.mxu0 %v878_v34  ;;  %v299_v34 = vld [vmem:[#allocation2 + $0x338] sm:$0xff] }
  0x65   :  { %881 = vmatprep.subr.bf16.mxu0 %v880_v35  ;;  %v918_v35 = vpack.c.bf16 %v294_v32, %v292_v31  ;;  %v920_v36 = vpack.c.bf16 %v299_v34, %v297_v33  ;;  %v557_v31 = vld [vmem:[#allocation4 + $0xa0] sm:$0xff]  ;;  %v562_v32 = vld [vmem:[#allocation4 + $0xc8] sm:$0xff] }
  0x66   :  { %v566_v33 = vld [vmem:[#allocation4 + $0xe8] sm:$0xff] }
  0x68   :  { %883 = vmatpush1.bf16.msra.mxu0 %v882_v38  ;;  %v298_v38 = vld [vmem:[#allocation2 + $0x330] sm:$0xff] }
  0x69   :  { %885 = vmatprep.subr.bf16.mxu0 %v884_v41  ;;  %v922_v41 = vpack.c.bf16 %v298_v38, %v296_v37  ;;  %v565_v37 = vld [vmem:[#allocation4 + $0xe0] sm:$0xff]  ;;  %v570_v38 = vld [vmem:[#allocation4 + $0x108] sm:$0xff] }
  0xfd   :  { %v120_v46 = vpop.f32.mrb[0].mxu0  ;;  %v1210_v52 = vpop.f32.mrb[0].mxu1 }
  0xfe   :  { %v122_v48 = vpop.f32.mrb[1].mxu0  ;;  %v193_v55 = vpop.f32.mrb[1].mxu1 }
  0xff   :  { %388 = vmatprep.mubr.f32.mxu0 %v122_v48 }
 0x100   :  { %389 = vmatmul.mubr.f32.vlgmr.msra.gmra.mrb[2].mxu0 %v120_v46  ;;  %v307_v46 = vld [vmem:[#allocation2 + $0x378] sm:$0xff] }
 0x101   :  { %887 = vmatpush1.bf16.msra.mxu0 %v886_v47  ;;  %459 = vmatprep.mubr.f32.mxu0 %v193_v55  ;;  %v926_v47 = vpack.c.bf16 %v302_v44, %v300_v43  ;;  %v928_v48 = vpack.c.bf16 %v307_v46, %v305_v45  ;;  %v932_v55 = vpack.c.bf16 %v311_v53, %v309_v51  ;;  %v578_v43 = vld [vmem:[#allocation4 + $0x148] sm:$0xff] }
 0x102   :  { %889 = vmatprep.subr.bf16.mxu0 %v888_v49  ;;  %v304_v49 = vld [vmem:[#allocation2 + $0x360] sm:$0xff]  ;;  %v582_v44 = vld [vmem:[#allocation4 + $0x168] sm:$0xff] }
 0x103   :  { %v930_v54 = vpack.c.bf16 %v306_v50, %v304_v49  ;;  %v968_v46 = vpack.c.bf16 %v582_v44, %v578_v43  ;;  %v586_v49 = vld [vmem:[#allocation4 + $0x188] sm:$0xff]  ;;  %v657_v43 = vld [vmem:[#allocation4 + $0x3c0] sm:$0xff] }
 0x104   :  { %v590_v50 = vld [vmem:[#allocation4 + $0x1a8] sm:$0xff]  ;;  %v661_v44 = vld [vmem:[#allocation4 + $0x3e0] sm:$0xff] }
 0x105   :  { %891 = vmatpush1.bf16.msra.mxu0 %v890_v56  ;;  %v308_v56 = vld [vmem:[#allocation2 + $0x380] sm:$0xff]  ;;  %v972_v53 = vpack.c.bf16 %v590_v50, %v586_v49  ;;  %v539_v49 = vld [vmem:[#allocation4 + $0x10] sm:$0xff] }
 0x106   :  { %893 = vmatprep.subr.bf16.mxu0 %v892_v57  ;;  %v310_v57 = vld [vmem:[#allocation2 + $0x390] sm:$0xff] }
 0x107   :  { %v934_v60 = vpack.c.bf16 %v310_v57, %v308_v56  ;;  %v594_v56 = vld [vmem:[#allocation4 + $0x1c8] sm:$0xff]  ;;  %v543_v50 = vld [vmem:[#allocation4 + $0x30] sm:$0xff] }
 0x108   :  { %v598_v57 = vld [vmem:[#allocation4 + $0x1e8] sm:$0xff] }
 0x109   :  { %895 = vmatpush1.bf16.msra.mxu0 %v894_v62  ;;  %v312_v62 = vld [vmem:[#allocation2 + $0x3a0] sm:$0xff]  ;;  %v976_v59 = vpack.c.bf16 %v598_v57, %v594_v56 }
 0x10a   :  { %897 = vmatprep.subr.bf16.mxu0 %v896_v63  ;;  %v314_v63 = vld [vmem:[#allocation2 + $0x3b0] sm:$0xff] }
 0x10b   :  { %v938_v2 = vpack.c.bf16 %v314_v63, %v312_v62  ;;  %v602_v62 = vld [vmem:[#allocation4 + $0x208] sm:$0xff] }
 0x10c   :  { %v606_v63 = vld [vmem:[#allocation4 + $0x228] sm:$0xff] }
 0x10d   :  { %899 = vmatpush1.bf16.msra.mxu0 %v898_v5  ;;  %v316_v5 = vld [vmem:[#allocation2 + $0x3c0] sm:$0xff]  ;;  %v980_v1 = vpack.c.bf16 %v606_v63, %v602_v62 }
 0x10e   :  { %901 = vmatprep.subr.bf16.mxu0 %v900_v6  ;;  %v318_v6 = vld [vmem:[#allocation2 + $0x3d0] sm:$0xff] }
 0x10f   :  { %v942_v9 = vpack.c.bf16 %v318_v6, %v316_v5  ;;  %v610_v5 = vld [vmem:[#allocation4 + $0x248] sm:$0xff] }
 0x110   :  { %v614_v6 = vld [vmem:[#allocation4 + $0x268] sm:$0xff] }
 0x111   :  { %903 = vmatpush1.bf16.msra.mxu0 %v902_v11  ;;  %v320_v11 = vld [vmem:[#allocation2 + $0x3e0] sm:$0xff]  ;;  %v984_v8 = vpack.c.bf16 %v614_v6, %v610_v5 }
 0x112   :  { %905 = vmatprep.subr.bf16.mxu0 %v904_v12  ;;  %v322_v12 = vld [vmem:[#allocation2 + $0x3f0] sm:$0xff] }
 0x113   :  { %v946_v13 = vpack.c.bf16 %v322_v12, %v320_v11  ;;  %v618_v11 = vld [vmem:[#allocation4 + $0x288] sm:$0xff] }
 0x114   :  { %v622_v12 = vld [vmem:[#allocation4 + $0x2a8] sm:$0xff] }
 0x115   :  { %907 = vmatpush1.bf16.msra.mxu0 %v906_v17  ;;  %v541_v17 = vld [vmem:[#allocation4 + $0x20] sm:$0xff]  ;;  %v988_v14 = vpack.c.bf16 %v622_v12, %v618_v11 }
 0x116   :  { %909 = vmatprep.subr.bf16.mxu0 %v908_v18  ;;  %v546_v18 = vld [vmem:[#allocation4 + $0x48] sm:$0xff] }
 0x119   :  { %911 = vmatpush1.bf16.msra.mxu0 %v910_v23  ;;  %v950_v23 = vpack.c.bf16 %v541_v17, %v537_v16  ;;  %v621_v16 = vld [vmem:[#allocation4 + $0x2a0] sm:$0xff]  ;;  %v626_v17 = vld [vmem:[#allocation4 + $0x2c8] sm:$0xff] }
 0x11a   :  { %913 = vmatprep.subr.bf16.mxu0 %v912_v24  ;;  %v952_v24 = vpack.c.bf16 %v550_v19, %v546_v18  ;;  %v630_v18 = vld [vmem:[#allocation4 + $0x2e8] sm:$0xff]  ;;  %v990_v19 = vpack.c.bf16 %v621_v16, %v617_v15  ;;  %v580_v15 = vld [vmem:[#allocation4 + $0x158] sm:$0xff] }
 0x11b   :  { %v584_v16 = vld [vmem:[#allocation4 + $0x178] sm:$0xff] }
 0x11d   :  { %915 = vmatpush1.bf16.msra.mxu0 %v914_v29  ;;  %v956_v29 = vpack.c.bf16 %v558_v28, %v554_v27  ;;  %v633_v27 = vld [vmem:[#allocation4 + $0x300] sm:$0xff] }
 0x11e   :  { %917 = vmatprep.subr.bf16.mxu0 %v916_v30  ;;  %v553_v30 = vld [vmem:[#allocation4 + $0x80] sm:$0xff] }
 0x11f   :  { %v958_v34 = vpack.c.bf16 %v557_v31, %v553_v30  ;;  %v637_v28 = vld [vmem:[#allocation4 + $0x320] sm:$0xff] }
 0x120   :  { %v998_v30 = vpack.c.bf16 %v637_v28, %v633_v27  ;;  %v596_v27 = vld [vmem:[#allocation4 + $0x1d8] sm:$0xff] }
 0x121   :  { %919 = vmatpush1.bf16.msra.mxu0 %v918_v35  ;;  %v960_v35 = vpack.c.bf16 %v566_v33, %v562_v32  ;;  %v641_v32 = vld [vmem:[#allocation4 + $0x340] sm:$0xff]  ;;  %v600_v28 = vld [vmem:[#allocation4 + $0x1f8] sm:$0xff] }
 0x122   :  { %921 = vmatprep.subr.bf16.mxu0 %v920_v36  ;;  %v561_v36 = vld [vmem:[#allocation4 + $0xc0] sm:$0xff] }
 0x123   :  { %v962_v40 = vpack.c.bf16 %v565_v37, %v561_v36  ;;  %v645_v33 = vld [vmem:[#allocation4 + $0x360] sm:$0xff] }
 0x124   :  { %v1002_v36 = vpack.c.bf16 %v645_v33, %v641_v32  ;;  %v604_v32 = vld [vmem:[#allocation4 + $0x218] sm:$0xff] }
 0x125   :  { %923 = vmatpush1.bf16.msra.mxu0 %v922_v41  ;;  %v569_v41 = vld [vmem:[#allocation4 + $0x100] sm:$0xff]  ;;  %v608_v33 = vld [vmem:[#allocation4 + $0x238] sm:$0xff] }
 0x126   :  { %925 = vmatprep.subr.bf16.mxu0 %v924_v42  ;;  %v573_v42 = vld [vmem:[#allocation4 + $0x120] sm:$0xff] }
 0x127   :  { %v966_v45 = vpack.c.bf16 %v573_v42, %v569_v41 }
 0x129   :  { %927 = vmatpush1.bf16.msra.mxu0 %v926_v47  ;;  %v577_v47 = vld [vmem:[#allocation4 + $0x140] sm:$0xff] }
 0x12a   :  { %929 = vmatprep.subr.bf16.mxu0 %v928_v48  ;;  %v581_v48 = vld [vmem:[#allocation4 + $0x160] sm:$0xff] }
 0x12b   :  { %v970_v51 = vpack.c.bf16 %v581_v48, %v577_v47  ;;  %v544_v47 = vld [vmem:[#allocation4 + $0x38] sm:$0xff] }
 0x12d   :  { %931 = vmatpush1.bf16.msra.mxu0 %v930_v54  ;;  %v585_v54 = vld [vmem:[#allocation4 + $0x180] sm:$0xff] }
 0x12e   :  { %933 = vmatprep.subr.bf16.mxu0 %v932_v55  ;;  %v589_v55 = vld [vmem:[#allocation4 + $0x1a0] sm:$0xff] }
 0x12f   :  { %v974_v58 = vpack.c.bf16 %v589_v55, %v585_v54  ;;  %v1014_v55 = vpack.c.bf16 %v543_v50, %v539_v49  ;;  %v628_v49 = vld [vmem:[#allocation4 + $0x2d8] sm:$0xff] }
 0x130   :  { %v632_v50 = vld [vmem:[#allocation4 + $0x2f8] sm:$0xff] }
 0x131   :  { %935 = vmatpush1.bf16.msra.mxu0 %v934_v60  ;;  %v593_v60 = vld [vmem:[#allocation4 + $0x1c0] sm:$0xff] }
 0x132   :  { %937 = vmatprep.subr.bf16.mxu0 %v936_v61  ;;  %v597_v61 = vld [vmem:[#allocation4 + $0x1e0] sm:$0xff] }
 0x133   :  { %v978_v0 = vpack.c.bf16 %v597_v61, %v593_v60  ;;  %v556_v60 = vld [vmem:[#allocation4 + $0x98] sm:$0xff] }
 0x134   :  { %v560_v61 = vld [vmem:[#allocation4 + $0xb8] sm:$0xff] }
 0x135   :  { %939 = vmatpush1.bf16.msra.mxu0 %v938_v2  ;;  %v601_v2 = vld [vmem:[#allocation4 + $0x200] sm:$0xff]  ;;  %v1020_v63 = vpack.c.bf16 %v560_v61, %v556_v60  ;;  %v635_v61 = vld [vmem:[#allocation4 + $0x310] sm:$0xff] }
 0x136   :  { %941 = vmatprep.subr.bf16.mxu0 %v940_v4  ;;  %v605_v4 = vld [vmem:[#allocation4 + $0x220] sm:$0xff] }
 0x137   :  { %v982_v7 = vpack.c.bf16 %v605_v4, %v601_v2  ;;  %v564_v2 = vld [vmem:[#allocation4 + $0xd8] sm:$0xff] }
 0x138   :  { %v568_v4 = vld [vmem:[#allocation4 + $0xf8] sm:$0xff] }
 0x139   :  { %943 = vmatpush1.bf16.msra.mxu0 %v942_v9  ;;  %v609_v9 = vld [vmem:[#allocation4 + $0x240] sm:$0xff]  ;;  %v1024_v6 = vpack.c.bf16 %v568_v4, %v564_v2  ;;  %v643_v4 = vld [vmem:[#allocation4 + $0x350] sm:$0xff] }
 0x13a   :  { %945 = vmatprep.subr.bf16.mxu0 %v944_v10  ;;  %v613_v10 = vld [vmem:[#allocation4 + $0x260] sm:$0xff] }
 0x13d   :  { %947 = vmatpush1.bf16.msra.mxu0 %v946_v13  ;;  %v986_v13 = vpack.c.bf16 %v613_v10, %v609_v9  ;;  %v572_v9 = vld [vmem:[#allocation4 + $0x118] sm:$0xff] }
 0x13e   :  { %v576_v10 = vld [vmem:[#allocation4 + $0x138] sm:$0xff] }
 0x13f   :  { %v1028_v12 = vpack.c.bf16 %v576_v10, %v572_v9  ;;  %v651_v10 = vld [vmem:[#allocation4 + $0x390] sm:$0xff] }
 0x140   :  { %460 = vmatmul.mubr.f32.vlgmr.msra.gmra.mrb[2].mxu0 %v1210_v52  ;;  %v954_v52 = vpack.c.bf16 %v549_v26, %v545_v25 }
 0x213   :  { %v461_v20 = vpop.f32.mrb[2].mxu0 }
 0x214   :  { %v463_v22 = vpop.f32.mrb[3].mxu0 }
 0x215   :  { %466 = vmatprep.subr.mxu1 %v463_v22  ;;  %v629_v22 = vld [vmem:[#allocation4 + $0x2e0] sm:$0xff] }
 0x216   :  { %467 = vmatpush1.msra.mxu1 %v461_v20  ;;  %v992_v20 = vpack.c.bf16 %v630_v18, %v626_v17  ;;  %v1032_v18 = vpack.c.bf16 %v584_v16, %v580_v15  ;;  %v659_v16 = vld [vmem:[#allocation4 + $0x3d0] sm:$0xff] }
 0x217   :  { %819 = vmatmul.mubr.msk.f32.vlgmr.msra.gmra.mrb[2].mxu1 %vm50_vm0, %v1198_v3  ;;  %949 = vmatprep.subr.bf16.mxu1 %v948_v21  ;;  %v964_v3 = vpack.c.bf16 %v574_v39, %v570_v38  ;;  %v625_v21 = vld [vmem:[#allocation4 + $0x2c0] sm:$0xff] }
 0x218   :  { %951 = vmatpush1.bf16.msra.mxu1 %v950_v23  ;;  %v634_v23 = vld [vmem:[#allocation4 + $0x308] sm:$0xff]  ;;  %v994_v25 = vpack.c.bf16 %v629_v22, %v625_v21  ;;  %v649_v38 = vld [vmem:[#allocation4 + $0x380] sm:$0xff]  ;;  %v588_v21 = vld [vmem:[#allocation4 + $0x198] sm:$0xff] }
 0x219   :  { %953 = vmatprep.subr.bf16.mxu1 %v952_v24  ;;  %v638_v24 = vld [vmem:[#allocation4 + $0x328] sm:$0xff]  ;;  %v653_v39 = vld [vmem:[#allocation4 + $0x3a0] sm:$0xff]  ;;  %v592_v22 = vld [vmem:[#allocation4 + $0x1b8] sm:$0xff] }
 0x21a   :  { %v996_v26 = vpack.c.bf16 %v638_v24, %v634_v23  ;;  %v1006_v41 = vpack.c.bf16 %v653_v39, %v649_v38  ;;  %v1036_v24 = vpack.c.bf16 %v592_v22, %v588_v21  ;;  %v612_v38 = vld [vmem:[#allocation4 + $0x258] sm:$0xff] }
 0x21b   :  { %v616_v39 = vld [vmem:[#allocation4 + $0x278] sm:$0xff] }
 0x21c   :  { %955 = vmatpush1.bf16.msra.mxu1 %v954_v52  ;;  %v642_v52 = vld [vmem:[#allocation4 + $0x348] sm:$0xff] }
 0x21d   :  { %957 = vmatprep.subr.bf16.mxu1 %v956_v29  ;;  %v646_v29 = vld [vmem:[#allocation4 + $0x368] sm:$0xff] }
 0x21e   :  { %v1000_v31 = vpack.c.bf16 %v646_v29, %v642_v52  ;;  %v1040_v29 = vpack.c.bf16 %v600_v28, %v596_v27 }
 0x220   :  { %959 = vmatpush1.bf16.msra.mxu1 %v958_v34  ;;  %v650_v34 = vld [vmem:[#allocation4 + $0x388] sm:$0xff] }
 0x221   :  { %961 = vmatprep.subr.bf16.mxu1 %v960_v35  ;;  %v654_v35 = vld [vmem:[#allocation4 + $0x3a8] sm:$0xff] }
 0x222   :  { %v1004_v37 = vpack.c.bf16 %v654_v35, %v650_v34  ;;  %v1044_v35 = vpack.c.bf16 %v608_v33, %v604_v32 }
 0x224   :  { %963 = vmatpush1.bf16.msra.mxu1 %v962_v40  ;;  %v658_v40 = vld [vmem:[#allocation4 + $0x3c8] sm:$0xff] }
 0x225   :  { %965 = vmatprep.subr.bf16.mxu1 %v964_v3  ;;  %v662_v3 = vld [vmem:[#allocation4 + $0x3e8] sm:$0xff] }
 0x226   :  { %v1008_v42 = vpack.c.bf16 %v662_v3, %v658_v40  ;;  %v1048_v3 = vpack.c.bf16 %v616_v39, %v612_v38 }
 0x228   :  { %967 = vmatpush1.bf16.msra.mxu1 %v966_v45  ;;  %v1010_v45 = vpack.c.bf16 %v661_v44, %v657_v43  ;;  %v620_v43 = vld [vmem:[#allocation4 + $0x298] sm:$0xff] }
 0x229   :  { %969 = vmatprep.subr.bf16.mxu1 %v968_v46  ;;  %v540_v46 = vld [vmem:[#allocation4 + $0x18] sm:$0xff] }
 0x22a   :  { %v1012_v48 = vpack.c.bf16 %v544_v47, %v540_v46  ;;  %v624_v44 = vld [vmem:[#allocation4 + $0x2b8] sm:$0xff]  ;;  %v619_v47 = vld [vmem:[#allocation4 + $0x290] sm:$0xff] }
 0x22b   :  { %v1052_v46 = vpack.c.bf16 %v624_v44, %v620_v43 }
 0x22c   :  { %971 = vmatpush1.bf16.msra.mxu1 %v970_v51  ;;  %v548_v51 = vld [vmem:[#allocation4 + $0x58] sm:$0xff] }
 0x22d   :  { %973 = vmatprep.subr.bf16.mxu1 %v972_v53  ;;  %v552_v53 = vld [vmem:[#allocation4 + $0x78] sm:$0xff] }
 0x22e   :  { %v1016_v57 = vpack.c.bf16 %v552_v53, %v548_v51  ;;  %v1056_v53 = vpack.c.bf16 %v632_v50, %v628_v49 }
 0x230   :  { %975 = vmatpush1.bf16.msra.mxu1 %v974_v58  ;;  %v547_v58 = vld [vmem:[#allocation4 + $0x50] sm:$0xff] }
 0x231   :  { %977 = vmatprep.subr.bf16.mxu1 %v976_v59  ;;  %v551_v59 = vld [vmem:[#allocation4 + $0x70] sm:$0xff] }
 0x232   :  { %v1018_v62 = vpack.c.bf16 %v551_v59, %v547_v58  ;;  %v640_v58 = vld [vmem:[#allocation4 + $0x338] sm:$0xff] }
 0x234   :  { %979 = vmatpush1.bf16.msra.mxu1 %v978_v0  ;;  %v555_v0 = vld [vmem:[#allocation4 + $0x90] sm:$0xff] }
 0x235   :  { %981 = vmatprep.subr.bf16.mxu1 %v980_v1  ;;  %v559_v1 = vld [vmem:[#allocation4 + $0xb0] sm:$0xff] }
 0x236   :  { %v1022_v5 = vpack.c.bf16 %v559_v1, %v555_v0  ;;  %v648_v0 = vld [vmem:[#allocation4 + $0x378] sm:$0xff] }
 0x238   :  { %983 = vmatpush1.bf16.msra.mxu1 %v982_v7  ;;  %v563_v7 = vld [vmem:[#allocation4 + $0xd0] sm:$0xff] }
 0x239   :  { %985 = vmatprep.subr.bf16.mxu1 %v984_v8  ;;  %v567_v8 = vld [vmem:[#allocation4 + $0xf0] sm:$0xff] }
 0x23a   :  { %v1026_v11 = vpack.c.bf16 %v567_v8, %v563_v7  ;;  %v656_v7 = vld [vmem:[#allocation4 + $0x3b8] sm:$0xff] }
 0x23c   :  { %987 = vmatpush1.bf16.msra.mxu1 %v986_v13  ;;  %v571_v13 = vld [vmem:[#allocation4 + $0x110] sm:$0xff] }
 0x23d   :  { %989 = vmatprep.subr.bf16.mxu1 %v988_v14  ;;  %v575_v14 = vld [vmem:[#allocation4 + $0x130] sm:$0xff] }
 0x23e   :  { %v1030_v17 = vpack.c.bf16 %v575_v14, %v571_v13  ;;  %v664_v13 = vld [vmem:[#allocation4 + $0x3f8] sm:$0xff] }
 0x240   :  { %991 = vmatpush1.bf16.msra.mxu1 %v990_v19  ;;  %v579_v19 = vld [vmem:[#allocation4 + $0x150] sm:$0xff] }
 0x241   :  { %993 = vmatprep.subr.bf16.mxu1 %v992_v20  ;;  %v583_v20 = vld [vmem:[#allocation4 + $0x170] sm:$0xff] }
 0x242   :  { %v1034_v23 = vpack.c.bf16 %v583_v20, %v579_v19 }
 0x244   :  { %995 = vmatpush1.bf16.msra.mxu1 %v994_v25  ;;  %v587_v25 = vld [vmem:[#allocation4 + $0x190] sm:$0xff] }
 0x245   :  { %997 = vmatprep.subr.bf16.mxu1 %v996_v26  ;;  %v591_v26 = vld [vmem:[#allocation4 + $0x1b0] sm:$0xff] }
 0x246   :  { %v1038_v52 = vpack.c.bf16 %v591_v26, %v587_v25 }
 0x248   :  { %999 = vmatpush1.bf16.msra.mxu1 %v998_v30  ;;  %v595_v30 = vld [vmem:[#allocation4 + $0x1d0] sm:$0xff] }
 0x249   :  { %1001 = vmatprep.subr.bf16.mxu1 %v1000_v31  ;;  %v599_v31 = vld [vmem:[#allocation4 + $0x1f0] sm:$0xff] }
 0x24a   :  { %v1042_v34 = vpack.c.bf16 %v599_v31, %v595_v30 }
 0x24c   :  { %1003 = vmatpush1.bf16.msra.mxu1 %v1002_v36  ;;  %v603_v36 = vld [vmem:[#allocation4 + $0x210] sm:$0xff] }
 0x24d   :  { %1005 = vmatprep.subr.bf16.mxu1 %v1004_v37  ;;  %v607_v37 = vld [vmem:[#allocation4 + $0x230] sm:$0xff] }
 0x24e   :  { %v1046_v40 = vpack.c.bf16 %v607_v37, %v603_v36 }
 0x250   :  { %1007 = vmatpush1.bf16.msra.mxu1 %v1006_v41  ;;  %v611_v41 = vld [vmem:[#allocation4 + $0x250] sm:$0xff] }
 0x251   :  { %1009 = vmatprep.subr.bf16.mxu1 %v1008_v42  ;;  %v615_v42 = vld [vmem:[#allocation4 + $0x270] sm:$0xff] }
 0x254   :  { %1011 = vmatpush1.bf16.msra.mxu1 %v1010_v45  ;;  %v1050_v45 = vpack.c.bf16 %v615_v42, %v611_v41 }
 0x255   :  { %1013 = vmatprep.subr.bf16.mxu1 %v1012_v48  ;;  %v623_v48 = vld [vmem:[#allocation4 + $0x2b0] sm:$0xff] }
 0x256   :  { %v1054_v51 = vpack.c.bf16 %v623_v48, %v619_v47 }
 0x2ea   :  { %v1215_v54 = vpop.f32.mrb[2].mxu1 }
 0x2eb   :  { %v534_v56 = vpop.f32.mrb[3].mxu1 }
 0x2ec   :  { %729 = vmatprep.mubr.f32.mxu1 %v534_v56 }
 0x2ed   :  { %730 = vmatmul.mubr.f32.vlgmr.msra.gmra.mrb[4].mxu1 %v1215_v54 }
 0x2ee   :  { %1015 = vmatpush1.bf16.msra.mxu1 %v1014_v55  ;;  %800 = vmatprep.mubr.f32.mxu1 %v534_v56  ;;  %v627_v55 = vld [vmem:[#allocation4 + $0x2d0] sm:$0xff] }
 0x2ef   :  { %1017 = vmatprep.subr.bf16.mxu1 %v1016_v57  ;;  %v631_v56 = vld [vmem:[#allocation4 + $0x2f0] sm:$0xff]  ;;  %v636_v57 = vld [vmem:[#allocation4 + $0x318] sm:$0xff] }
 0x2f0   :  { %v1058_v59 = vpack.c.bf16 %v631_v56, %v627_v55  ;;  %v1060_v60 = vpack.c.bf16 %v640_v58, %v636_v57 }
 0x2f2   :  { %1019 = vmatpush1.bf16.msra.mxu1 %v1018_v62  ;;  %v639_v62 = vld [vmem:[#allocation4 + $0x330] sm:$0xff] }
 0x2f3   :  { %1021 = vmatprep.subr.bf16.mxu1 %v1020_v63  ;;  %v644_v63 = vld [vmem:[#allocation4 + $0x358] sm:$0xff]  ;;  %v1062_v1 = vpack.c.bf16 %v639_v62, %v635_v61 }
 0x2f4   :  { %v1064_v2 = vpack.c.bf16 %v648_v0, %v644_v63 }
 0x2f6   :  { %1023 = vmatpush1.bf16.msra.mxu1 %v1022_v5  ;;  %v647_v5 = vld [vmem:[#allocation4 + $0x370] sm:$0xff] }
 0x2f7   :  { %1025 = vmatprep.subr.bf16.mxu1 %v1024_v6  ;;  %v652_v6 = vld [vmem:[#allocation4 + $0x398] sm:$0xff]  ;;  %v1066_v8 = vpack.c.bf16 %v647_v5, %v643_v4 }
 0x2f8   :  { %v1068_v9 = vpack.c.bf16 %v656_v7, %v652_v6 }
 0x2fa   :  { %1027 = vmatpush1.bf16.msra.mxu1 %v1026_v11  ;;  %v655_v11 = vld [vmem:[#allocation4 + $0x3b0] sm:$0xff] }
 0x2fb   :  { %1029 = vmatprep.subr.bf16.mxu1 %v1028_v12  ;;  %v660_v12 = vld [vmem:[#allocation4 + $0x3d8] sm:$0xff]  ;;  %v1070_v14 = vpack.c.bf16 %v655_v11, %v651_v10 }
 0x2fc   :  { %v1072_v15 = vpack.c.bf16 %v664_v13, %v660_v12 }
 0x2fe   :  { %1031 = vmatpush1.bf16.msra.mxu1 %v1030_v17  ;;  %v663_v17 = vld [vmem:[#allocation4 + $0x3f0] sm:$0xff] }
 0x2ff   :  { %1033 = vmatprep.subr.bf16.mxu1 %v1032_v18  ;;  %v1074_v18 = vpack.c.bf16 %v663_v17, %v659_v16 }
 0x302   :  { %1035 = vmatpush1.bf16.msra.mxu1 %v1034_v23 }
 0x303   :  { %1037 = vmatprep.subr.bf16.mxu1 %v1036_v24 }
 0x306   :  { %1039 = vmatpush1.bf16.msra.mxu1 %v1038_v52 }
 0x307   :  { %1041 = vmatprep.subr.bf16.mxu1 %v1040_v29 }
 0x30a   :  { %1043 = vmatpush1.bf16.msra.mxu1 %v1042_v34 }
 0x30b   :  { %1045 = vmatprep.subr.bf16.mxu1 %v1044_v35 }
 0x30e   :  { %1047 = vmatpush1.bf16.msra.mxu1 %v1046_v40 }
 0x30f   :  { %1049 = vmatprep.subr.bf16.mxu1 %v1048_v3 }
 0x312   :  { %1051 = vmatpush1.bf16.msra.mxu1 %v1050_v45 }
 0x313   :  { %1053 = vmatprep.subr.bf16.mxu1 %v1052_v46 }
 0x316   :  { %1055 = vmatpush1.bf16.msra.mxu1 %v1054_v51 }
 0x317   :  { %1057 = vmatprep.subr.bf16.mxu1 %v1056_v53 }
 0x31a   :  { %1059 = vmatpush1.bf16.msra.mxu1 %v1058_v59 }
 0x31b   :  { %1061 = vmatprep.subr.bf16.mxu1 %v1060_v60 }
 0x31e   :  { %1063 = vmatpush1.bf16.msra.mxu1 %v1062_v1 }
 0x31f   :  { %1065 = vmatprep.subr.bf16.mxu1 %v1064_v2 }
 0x322   :  { %1067 = vmatpush1.bf16.msra.mxu1 %v1066_v8 }
 0x323   :  { %1069 = vmatprep.subr.bf16.mxu1 %v1068_v9 }
 0x326   :  { %1071 = vmatpush1.bf16.msra.mxu1 %v1070_v14 }
 0x327   :  { %1073 = vmatprep.subr.bf16.mxu1 %v1072_v15 }
 0x32a   :  { %1075 = vmatpush1.bf16.msra.mxu1 %v1074_v18 }
 0x32d   :  { %801 = vmatmul.mubr.f32.vlgmr.msra.gmra.mrb[6].mxu1 %v1215_v54 }
 0x3c0   :  { %v731_v19 = vpop.f32.mrb[4].mxu1 }
 0x3c1   :  { %807 = vst [vmem:[%s1235_s4] sm:$0xff] %v731_v19  ;;  %v733_v20 = vpop.f32.mrb[5].mxu1 }
 0x3c2   :  { %808 = vst [vmem:[%s1235_s4 + $0x8] sm:$0xff] %v733_v20 }
 0x400   :  { %v802_v21 = vpop.f32.mrb[6].mxu1 }
 0x401   :  { %809 = vst [vmem:[%s1235_s4 + $0x10] sm:$0xff] %v802_v21  ;;  %v804_v22 = vpop.f32.mrb[7].mxu1 }
 0x402   :  { %810 = vst [vmem:[%s1235_s4 + $0x18] sm:$0xff] %v804_v22 }
 0x403   :  { %815 = vsyncpa [#allocation3], 1 }
 0x404   :  { %816 = vsyncpa [#allocation5], 1 }

</bundles_post_ra>
